<compile_context>
chip_gen: v6e
topology: v6e:2x2x1
jax: 0.10.0
libtpu: 0.0.40
codegen_flags: <defaults>
</compile_context>

<pallas_src>
import math

import jax
import jax.numpy as jnp
from jax import lax
from jax.experimental import pallas as pl
from jax.experimental.pallas import tpu as pltpu

EPS = 1e-4
NEG_SLOPE = 0.333

TILE_TARGET_BYTES = 2 << 20    # ~2 MiB input tiles for the streamed path
FUSED_MAX_BYTES = 4 << 20      # f32 bytes of x_dense below which we fuse
VMEM_LIMIT_BYTES = 40 << 20    # safe on v5e/v6e (128 MiB) and v7x (64 MiB phys)


def _lane_fold_tree(arr, c, c_dense):
    """Sum the G lane-groups of a (1, G*C) array so EVERY lane ends up holding
    the total for its channel (lane % C).  log2(G) roll+add steps on the XLU."""
    k = c
    while k < c_dense:
        arr = arr + pltpu.roll(arr, k, 1)
        k *= 2
    return arr


def _make_fused_kernel(c, c_dense, inv_n):
    """Single-pass: stats + affine fold + normalize + LeakyReLU, x read once."""

    def kernel(x_ref, gamma_ref, beta_ref, o_ref):
        x = x_ref[...].astype(jnp.float32)
        s = jnp.sum(x, axis=0, keepdims=True)
        q = jnp.sum(x * x, axis=0, keepdims=True)
        s = _lane_fold_tree(s, c, c_dense)
        q = _lane_fold_tree(q, c, c_dense)
        mean = s * inv_n
        var = jnp.maximum(q * inv_n - mean * mean, 0.0)
        inv_std = lax.rsqrt(var + EPS)
        scale = gamma_ref[...] * inv_std
        shift = beta_ref[...] - mean * scale
        y = x * scale + shift
        y = jnp.maximum(y, NEG_SLOPE * y)      # slope < 1 => max == LeakyReLU
        o_ref[...] = y.astype(o_ref.dtype)

    return kernel


def _make_stats_kernel(c, c_dense, inv_n, rows_total, tile_rows, need_row_mask):
    """Streamed pass 1: accumulate per-lane sum/sumsq across row tiles; on the
    last grid step fold groups and emit lane-dense scale/shift directly."""

    def kernel(x_ref, gamma_ref, beta_ref, scale_ref, shift_ref,
               sum_ref, sq_ref):
        t = pl.program_id(0)

        @pl.when(t == 0)
        def _():
            sum_ref[...] = jnp.zeros_like(sum_ref)
            sq_ref[...] = jnp.zeros_like(sq_ref)

        x = x_ref[...].astype(jnp.float32)
        if need_row_mask:
            # Last tile extends past rows_total: those rows are garbage reads,
            # zero them out before accumulating.
            row_ids = lax.broadcasted_iota(jnp.int32, (tile_rows, 1), 0)
            valid = (t * tile_rows + row_ids) < rows_total
            x = jnp.where(valid, x, 0.0)
        sum_ref[...] += jnp.sum(x, axis=0, keepdims=True)
        sq_ref[...] += jnp.sum(x * x, axis=0, keepdims=True)

        @pl.when(t == pl.num_programs(0) - 1)
        def _():
            s = _lane_fold_tree(sum_ref[...], c, c_dense)
            q = _lane_fold_tree(sq_ref[...], c, c_dense)
            mean = s * inv_n
            var = jnp.maximum(q * inv_n - mean * mean, 0.0)
            inv_std = lax.rsqrt(var + EPS)
            scale = gamma_ref[...] * inv_std
            scale_ref[...] = scale
            shift_ref[...] = beta_ref[...] - mean * scale

    return kernel


def _normalize_kernel(x_ref, scale_ref, shift_ref, o_ref):
    """Streamed pass 2: y = x*scale + shift, LeakyReLU as a single max.
    Out-of-bounds tail rows compute garbage; Pallas drops those writes."""
    x = x_ref[...].astype(jnp.float32)
    y = x * scale_ref[...] + shift_ref[...]
    o_ref[...] = jnp.maximum(y, NEG_SLOPE * y).astype(o_ref.dtype)


def instance_norm_relu(features, gamma, beta, *, tile_rows=None,
                       max_fused_bytes=FUSED_MAX_BYTES):
    """features: (N, C); gamma, beta: (C,).  Returns (N, C)."""
    n, c = features.shape
    orig_dtype = features.dtype
    itemsize = jnp.dtype(orig_dtype).itemsize

    # Minimal lane fold: G points packed into the lane axis so the last dim is
    # a multiple of 128 (C=8 -> G=16 -> 128 lanes).  Minimal G keeps the pad
    # (when needed) below G rows and maximizes the chance the reshape is free.
    g = 128 // math.gcd(c, 128)
    c_dense = g * c

    rows_total = -(-n // g)
    n_pad = rows_total * g

    x = features
    if n_pad != n:
        # TODO(synk): this minimal (< G rows) zero-pad still makes XLA copy x;
        # a fully copy-free ragged path would need the kernel to consume the
        # raw (N, C) layout directly.  Pad points contribute 0 to sum/sumsq
        # (we divide by the true N) and are sliced off at the end.
        x = jnp.pad(x, ((0, n_pad - n), (0, 0)))
    x_dense = x.reshape(rows_total, c_dense)

    gamma_dense = jnp.tile(gamma.astype(jnp.float32), (g,)).reshape(1, c_dense)
    beta_dense = jnp.tile(beta.astype(jnp.float32), (g,)).reshape(1, c_dense)

    inv_n = 1.0 / n
    compiler_params_red = pltpu.CompilerParams(
        dimension_semantics=("arbitrary",),
        vmem_limit_bytes=VMEM_LIMIT_BYTES)
    compiler_params_par = pltpu.CompilerParams(
        dimension_semantics=("parallel",),
        vmem_limit_bytes=VMEM_LIMIT_BYTES)

    x_f32_bytes = rows_total * c_dense * 4

    if tile_rows is None and x_f32_bytes <= max_fused_bytes:
        # ---- fused single-pass path: x read from HBM once, written once ----
        out_dense = pl.pallas_call(
            _make_fused_kernel(c, c_dense, inv_n),
            out_shape=jax.ShapeDtypeStruct((rows_total, c_dense), orig_dtype),
            grid=(1,),
            in_specs=[pl.BlockSpec((rows_total, c_dense), lambda i: (0, 0)),
                      pl.BlockSpec((1, c_dense), lambda i: (0, 0)),
                      pl.BlockSpec((1, c_dense), lambda i: (0, 0))],
            out_specs=pl.BlockSpec((rows_total, c_dense), lambda i: (0, 0)),
            compiler_params=compiler_params_red,
        )(x_dense, gamma_dense, beta_dense)
    else:
        # ---- streamed two-pass path ----
        # Sub-32-bit dtypes pack rows per sublane -> round tile to the pack.
        row_pack = max(8, 32 // itemsize)
        if tile_rows is None:
            tile_rows = max(row_pack,
                            (TILE_TARGET_BYTES // (c_dense * itemsize))
                            // row_pack * row_pack)
        tile_rows = min(tile_rows, rows_total)
        num_tiles = -(-rows_total // tile_rows)
        need_row_mask = (rows_total % tile_rows) != 0

        # Pass 1: streamed stats; final grid step emits lane-dense scale/shift.
        scale_dense, shift_dense = pl.pallas_call(
            _make_stats_kernel(c, c_dense, inv_n, rows_total, tile_rows,
                               need_row_mask),
            out_shape=(jax.ShapeDtypeStruct((1, c_dense), jnp.float32),
                       jax.ShapeDtypeStruct((1, c_dense), jnp.float32)),
            grid=(num_tiles,),
            in_specs=[pl.BlockSpec((tile_rows, c_dense), lambda t: (t, 0)),
                      pl.BlockSpec((1, c_dense), lambda t: (0, 0)),
                      pl.BlockSpec((1, c_dense), lambda t: (0, 0))],
            out_specs=(pl.BlockSpec((1, c_dense), lambda t: (0, 0)),
                       pl.BlockSpec((1, c_dense), lambda t: (0, 0))),
            scratch_shapes=[pltpu.VMEM((1, c_dense), jnp.float32),
                            pltpu.VMEM((1, c_dense), jnp.float32)],
            compiler_params=compiler_params_red,
        )(x_dense, gamma_dense, beta_dense)

        # Pass 2: streamed normalize + LeakyReLU (megacore-shardable).
        out_dense = pl.pallas_call(
            _normalize_kernel,
            out_shape=jax.ShapeDtypeStruct((rows_total, c_dense), orig_dtype),
            grid=(num_tiles,),
            in_specs=[pl.BlockSpec((tile_rows, c_dense), lambda t: (t, 0)),
                      pl.BlockSpec((1, c_dense), lambda t: (0, 0)),
                      pl.BlockSpec((1, c_dense), lambda t: (0, 0))],
            out_specs=pl.BlockSpec((tile_rows, c_dense), lambda t: (t, 0)),
            compiler_params=compiler_params_par,
        )(x_dense, scale_dense, shift_dense)

    out = out_dense.reshape(n_pad, c)
    if n_pad != n:
        out = out[:n]
    return out


def _reference(features, gamma, beta):
    x = features.astype(jnp.float32)
    mean = jnp.mean(x, axis=0, keepdims=True)
    var = jnp.mean((x - mean) ** 2, axis=0, keepdims=True)
    y = (x - mean) / jnp.sqrt(var + EPS) * gamma[None, :] + beta[None, :]
    return jnp.where(y >= 0, y, NEG_SLOPE * y).astype(features.dtype)


if __name__ == "__main__":
    N, LATENT_DIM = 2000, 8

    key = jax.random.PRNGKey(0)
    k_feat, k_gamma, k_beta = jax.random.split(key, 3)

    features = jax.random.normal(k_feat, (N, LATENT_DIM), dtype=jnp.float32)
    # PyTorch init is gamma=1, beta=0; perturb so the affine path is exercised.
    gamma = 1.0 + 0.1 * jax.random.normal(k_gamma, (LATENT_DIM,), jnp.float32)
    beta = 0.1 * jax.random.normal(k_beta, (LATENT_DIM,), jnp.float32)

    # 1) Fused single-pass path (N divisible by G=16 -> no pad at all).
    ref = _reference(features, gamma, beta)
    out = jax.block_until_ready(instance_norm_relu(features, gamma, beta))
    assert jnp.allclose(out, ref, atol=1e-4, rtol=1e-4), "mismatch (fused)"

    # 2) Forced streamed two-pass path with a ragged last row-tile
    #    (125 rows, tile 32 -> 4 tiles, last tile masked in the stats kernel).
    out_tiled = jax.block_until_ready(
        instance_norm_relu(features, gamma, beta, tile_rows=32))
    assert jnp.allclose(out_tiled, ref, atol=1e-4, rtol=1e-4), "mismatch (tiled)"

    # 3) N not divisible by the lane-fold factor (minimal zero-pad path).
    N2 = 1999
    feats2 = features[:N2]
    ref2 = _reference(feats2, gamma, beta)
    out2 = jax.block_until_ready(instance_norm_relu(feats2, gamma, beta))
    assert jnp.allclose(out2, ref2, atol=1e-4, rtol=1e-4), "mismatch (ragged N)"

    print("KERNEL_OK")
</pallas_src>

<mosaic_0001>
module attributes {stable_mosaic.version = 11 : i64} {
  func.func @kernel(%arg0: i32, %arg1: memref<125x128xf32, #tpu.memory_space<vmem>>, %arg2: memref<1x128xf32, #tpu.memory_space<vmem>>, %arg3: memref<1x128xf32, #tpu.memory_space<vmem>>, %arg4: memref<125x128xf32, #tpu.memory_space<vmem>>) attributes {dimension_semantics = [#tpu.dimension_semantics<arbitrary>], iteration_bounds = array<i64: 1>, scalar_prefetch = 0 : i64, scratch_operands = 0 : i64, tpu.core_type = #tpu.core_type<tc>, window_params = [{pipeline_mode = #tpu.pipeline_mode<synchronous>, transform_indices = @transform_0, window_bounds = array<i64: 125, 128>}, {pipeline_mode = #tpu.pipeline_mode<synchronous>, transform_indices = @transform_1, window_bounds = array<i64: 1, 128>}, {pipeline_mode = #tpu.pipeline_mode<synchronous>, transform_indices = @transform_2, window_bounds = array<i64: 1, 128>}, {pipeline_mode = #tpu.pipeline_mode<synchronous>, transform_indices = @transform_3, window_bounds = array<i64: 125, 128>}]} {
    %c0 = arith.constant 0 : index
    %c0_0 = arith.constant 0 : index
    %0 = vector.load %arg1[%c0, %c0_0] : memref<125x128xf32, #tpu.memory_space<vmem>>, vector<125x128xf32>
    %cst = arith.constant dense<0.000000e+00> : vector<128xf32>
    %1 = vector.multi_reduction <add>, %0, %cst [0] : vector<125x128xf32> to vector<128xf32>
    %2 = vector.shape_cast %1 : vector<128xf32> to vector<1x128xf32>
    %3 = arith.mulf %0, %0 : vector<125x128xf32>
    %cst_1 = arith.constant dense<0.000000e+00> : vector<128xf32>
    %4 = vector.multi_reduction <add>, %3, %cst_1 [0] : vector<125x128xf32> to vector<128xf32>
    %5 = vector.shape_cast %4 : vector<128xf32> to vector<1x128xf32>
    %c8_i32 = arith.constant 8 : i32
    %6 = tpu.dynamic_rotate %2 by %c8_i32 dim 1 : vector<1x128xf32>, i32 -> vector<1x128xf32>
    %7 = arith.addf %2, %6 : vector<1x128xf32>
    %c16_i32 = arith.constant 16 : i32
    %8 = tpu.dynamic_rotate %7 by %c16_i32 dim 1 : vector<1x128xf32>, i32 -> vector<1x128xf32>
    %9 = arith.addf %7, %8 : vector<1x128xf32>
    %c32_i32 = arith.constant 32 : i32
    %10 = tpu.dynamic_rotate %9 by %c32_i32 dim 1 : vector<1x128xf32>, i32 -> vector<1x128xf32>
    %11 = arith.addf %9, %10 : vector<1x128xf32>
    %c64_i32 = arith.constant 64 : i32
    %12 = tpu.dynamic_rotate %11 by %c64_i32 dim 1 : vector<1x128xf32>, i32 -> vector<1x128xf32>
    %13 = arith.addf %11, %12 : vector<1x128xf32>
    %c8_i32_2 = arith.constant 8 : i32
    %14 = tpu.dynamic_rotate %5 by %c8_i32_2 dim 1 : vector<1x128xf32>, i32 -> vector<1x128xf32>
    %15 = arith.addf %5, %14 : vector<1x128xf32>
    %c16_i32_3 = arith.constant 16 : i32
    %16 = tpu.dynamic_rotate %15 by %c16_i32_3 dim 1 : vector<1x128xf32>, i32 -> vector<1x128xf32>
    %17 = arith.addf %15, %16 : vector<1x128xf32>
    %c32_i32_4 = arith.constant 32 : i32
    %18 = tpu.dynamic_rotate %17 by %c32_i32_4 dim 1 : vector<1x128xf32>, i32 -> vector<1x128xf32>
    %19 = arith.addf %17, %18 : vector<1x128xf32>
    %c64_i32_5 = arith.constant 64 : i32
    %20 = tpu.dynamic_rotate %19 by %c64_i32_5 dim 1 : vector<1x128xf32>, i32 -> vector<1x128xf32>
    %21 = arith.addf %19, %20 : vector<1x128xf32>
    %cst_6 = arith.constant 5.000000e-04 : f32
    %22 = vector.broadcast %cst_6 : f32 to vector<1x128xf32>
    %23 = arith.mulf %13, %22 : vector<1x128xf32>
    %cst_7 = arith.constant 5.000000e-04 : f32
    %24 = vector.broadcast %cst_7 : f32 to vector<1x128xf32>
    %25 = arith.mulf %21, %24 : vector<1x128xf32>
    %26 = arith.mulf %23, %23 : vector<1x128xf32>
    %27 = arith.subf %25, %26 : vector<1x128xf32>
    %cst_8 = arith.constant 0.000000e+00 : f32
    %28 = vector.broadcast %cst_8 : f32 to vector<1x128xf32>
    %29 = arith.maximumf %27, %28 : vector<1x128xf32>
    %cst_9 = arith.constant 9.99999974E-5 : f32
    %30 = vector.broadcast %cst_9 : f32 to vector<1x128xf32>
    %31 = arith.addf %29, %30 : vector<1x128xf32>
    %32 = math.rsqrt %31 : vector<1x128xf32>
    %c0_10 = arith.constant 0 : index
    %c0_11 = arith.constant 0 : index
    %33 = vector.load %arg2[%c0_10, %c0_11] : memref<1x128xf32, #tpu.memory_space<vmem>>, vector<1x128xf32>
    %34 = arith.mulf %33, %32 : vector<1x128xf32>
    %c0_12 = arith.constant 0 : index
    %c0_13 = arith.constant 0 : index
    %35 = vector.load %arg3[%c0_12, %c0_13] : memref<1x128xf32, #tpu.memory_space<vmem>>, vector<1x128xf32>
    %36 = arith.mulf %23, %34 : vector<1x128xf32>
    %37 = arith.subf %35, %36 : vector<1x128xf32>
    %38 = vector.broadcast %34 : vector<1x128xf32> to vector<125x128xf32>
    %39 = arith.mulf %0, %38 : vector<125x128xf32>
    %40 = vector.broadcast %37 : vector<1x128xf32> to vector<125x128xf32>
    %41 = arith.addf %39, %40 : vector<125x128xf32>
    %cst_14 = arith.constant 3.330000e-01 : f32
    %42 = vector.broadcast %cst_14 : f32 to vector<125x128xf32>
    %43 = arith.mulf %42, %41 : vector<125x128xf32>
    %44 = arith.maximumf %41, %43 : vector<125x128xf32>
    %c0_15 = arith.constant 0 : index
    %c0_16 = arith.constant 0 : index
    %45 = vector.load %arg4[%c0_15, %c0_16] : memref<125x128xf32, #tpu.memory_space<vmem>>, vector<125x128xf32>
    tpu.vector_store %arg4[%c0_15, %c0_16], %44 {strides = array<i32>} : memref<125x128xf32, #tpu.memory_space<vmem>>, vector<125x128xf32>,
    return
  }
  func.func @transform_0(%arg0: i32) -> (i32, i32) {
    %c0_i32 = arith.constant 0 : i32
    %c0_i32_0 = arith.constant 0 : i32
    %c0_i32_1 = arith.constant 0 : i32
    return %c0_i32, %c0_i32_0 : i32, i32
  }
  func.func @transform_1(%arg0: i32) -> (i32, i32) {
    %c0_i32 = arith.constant 0 : i32
    %c0_i32_0 = arith.constant 0 : i32
    %c0_i32_1 = arith.constant 0 : i32
    return %c0_i32, %c0_i32_0 : i32, i32
  }
  func.func @transform_2(%arg0: i32) -> (i32, i32) {
    %c0_i32 = arith.constant 0 : i32
    %c0_i32_0 = arith.constant 0 : i32
    %c0_i32_1 = arith.constant 0 : i32
    return %c0_i32, %c0_i32_0 : i32, i32
  }
  func.func @transform_3(%arg0: i32) -> (i32, i32) {
    %c0_i32 = arith.constant 0 : i32
    %c0_i32_0 = arith.constant 0 : i32
    %c0_i32_1 = arith.constant 0 : i32
    return %c0_i32, %c0_i32_0 : i32, i32
  }
}

</mosaic_0001>

<bundles_post_ra>
// kernel: tpu_custom_call.1
= control target key start
LH: loop header
LB: loop body
LE: loop exit
PB: predicated region body
PF: predicated region fallthrough
CT: control target
= control target key end

     0   :  { %8 = vsyncpa [#allocation3], 0  ;;  %s447_s0 = inlined_call_operand.hbm [shape: f32[125,128], index: 0, kind: input, shape index: {}]   ;;  %s448_s1 = inlined_call_operand.vmem [shape: f32[1,128], index: 1, kind: input, shape index: {}]   ;;  %s449_s2 = inlined_call_operand.vmem [shape: f32[1,128], index: 2, kind: input, shape index: {}]   ;;  %s450_s3 = inlined_call_operand.hbm [shape: f32[125,128], index: 3, kind: output, shape index: {}]  }
   0x1   :  { %9 = vsyncpa [#allocation4], 0  ;;  %s304_s12 = smov [#allocation2]  }
   0x2   :  { %s15_s13 = sshll.u32 %s304_s12, 4  ;;  %s16_s13 = int_to_ptr.vmem [resolvable:$true] %s15_s13 }
   0x3   :  { %s268_s14 = scalar_lea.vmem %s16_s13, 2048  ;;  %p273_p1 = scmp.lt.s32.totalorder %s16_s13, %s16_s13 }
   0x4   :  { %p269_p0 = scmp.ne.s32.totalorder %s16_s13, %s268_s14  ;;  %p274_p2 = scmp.lt.s32.totalorder %s268_s14, %s268_s14 }
   0x6   :  { %p275_p3 = por %p274_p2, %p273_p1 }
   0x8   :  { %p276_p4 = pnand %p275_p3, %p269_p0 }
   0xa   :  { %279 = shalt.err (!%p276_p4)
}
   0xb   :  { %s305_s15 = smov 128   ;;  %s306_s16 = smov 8  }
   0xc   :  { %21 = dma.hbm_to_vmem [thread:$0]  %s447_s0, 2048, %s16_s13, [#allocation3], %s305_s15, %s305_s15, %s306_s16  }
   0xd   :  { %300 = dma.done.wait [#allocation3], 2048  }
   0xe   :  { %301 = vsyncadd [#allocation3], 4294965248  ;;  %v337_v0 = vld [vmem:[#allocation2] sm:$0xff]  ;;  %v339_v1 = vld [vmem:[#allocation2 + $0x8] sm:$0xff]  ;;  %vm59_vm0 = vcmask 1044480   ;;  %s307_s0 = smov 16  }
   0xf   :  { %v341_v2 = vld [vmem:[#allocation2 + $0x10] sm:$0xff]  ;;  %v45_v3 = vadd.f32 %v339_v1, %v337_v0  ;;  %v68_v4 = vmul.f32 %v337_v0, %v337_v0  ;;  %v69_v5 = vmul.f32 %v339_v1, %v339_v1  ;;  %v349_v6 = vld [vmem:[#allocation2 + $0x18] sm:$0xff]  ;;  %v354_v9 = vld [vmem:[#allocation2 + $0x20] sm:$0xff]  ;;  %s308_s19 = smov 32   ;;  %s309_s20 = smov 64  }
  0x10   :  { %v70_v7 = vmul.f32 %v341_v2, %v341_v2  ;;  %v71_v10 = vmul.f32 %v349_v6, %v349_v6  ;;  %v359_v13 = vld [vmem:[#allocation2 + $0x28] sm:$0xff]  ;;  %v72_v14 = vmul.f32 %v354_v9, %v354_v9  ;;  %v364_v17 = vld [vmem:[#allocation2 + $0x30] sm:$0xff]  ;;  %v369_v21 = vld [vmem:[#allocation2 + $0x38] sm:$0xff] }
  0x11   :  { %v46_v8 = vadd.f32 %v45_v3, %v341_v2  ;;  %v84_v11 = vadd.f32 %v69_v5, %v68_v4  ;;  %v73_v18 = vmul.f32 %v359_v13, %v359_v13  ;;  %v74_v22 = vmul.f32 %v364_v17, %v364_v17  ;;  %v374_v25 = vld [vmem:[#allocation2 + $0x40] sm:$0xff]  ;;  %v379_v29 = vld [vmem:[#allocation2 + $0x48] sm:$0xff]  ;;  %v384_v33 = vld [vmem:[#allocation2 + $0x50] sm:$0xff] }
  0x12   :  { %v75_v26 = vmul.f32 %v369_v21, %v369_v21  ;;  %v76_v30 = vmul.f32 %v374_v25, %v374_v25  ;;  %v77_v34 = vmul.f32 %v379_v29, %v379_v29  ;;  %v389_v37 = vld [vmem:[#allocation2 + $0x58] sm:$0xff]  ;;  %v78_v38 = vmul.f32 %v384_v33, %v384_v33  ;;  %v394_v41 = vld [vmem:[#allocation2 + $0x60] sm:$0xff]  ;;  %v399_v45 = vld [vmem:[#allocation2 + $0x68] sm:$0xff] }
  0x13   :  { %v47_v12 = vadd.f32 %v46_v8, %v349_v6  ;;  %v85_v15 = vadd.f32 %v84_v11, %v70_v7  ;;  %v79_v42 = vmul.f32 %v389_v37, %v389_v37  ;;  %v80_v46 = vmul.f32 %v394_v41, %v394_v41  ;;  %v403_v48 = vld [vmem:[#allocation2 + $0x78] sm:$0x1f]  ;;  %v406_v50 = vld [vmem:[#allocation2 + $0x70] sm:$0xff] }
  0x14   :  { %v81_v51 = vmul.f32 %v399_v45, %v399_v45  ;;  %v83_v54 = vmul.f32 %v403_v48, %v403_v48  ;;  %v60_v55 = vsel %vm59_vm0, %v403_v48, 0.0  ;;  %v82_v56 = vmul.f32 %v406_v50, %v406_v50 }
  0x15   :  { %v48_v16 = vadd.f32 %v47_v12, %v354_v9  ;;  %v86_v19 = vadd.f32 %v85_v15, %v71_v10 }
  0x16   :  { %v98_v61 = vsel %vm59_vm0, %v83_v54, 0.0 }
  0x17   :  { %v49_v20 = vadd.f32 %v48_v16, %v359_v13  ;;  %v87_v23 = vadd.f32 %v86_v19, %v72_v14 }
  0x19   :  { %v50_v24 = vadd.f32 %v49_v20, %v364_v17  ;;  %v88_v27 = vadd.f32 %v87_v23, %v73_v18 }
  0x1b   :  { %v51_v28 = vadd.f32 %v50_v24, %v369_v21  ;;  %v89_v31 = vadd.f32 %v88_v27, %v74_v22 }
  0x1d   :  { %v52_v32 = vadd.f32 %v51_v28, %v374_v25  ;;  %v90_v35 = vadd.f32 %v89_v31, %v75_v26 }
  0x1f   :  { %v53_v36 = vadd.f32 %v52_v32, %v379_v29  ;;  %v91_v39 = vadd.f32 %v90_v35, %v76_v30 }
  0x21   :  { %v54_v40 = vadd.f32 %v53_v36, %v384_v33  ;;  %v92_v43 = vadd.f32 %v91_v39, %v77_v34 }
  0x23   :  { %v55_v44 = vadd.f32 %v54_v40, %v389_v37  ;;  %v93_v47 = vadd.f32 %v92_v43, %v78_v38 }
  0x25   :  { %v56_v49 = vadd.f32 %v55_v44, %v394_v41  ;;  %v94_v52 = vadd.f32 %v93_v47, %v79_v42 }
  0x27   :  { %v57_v53 = vadd.f32 %v56_v49, %v399_v45  ;;  %v95_v57 = vadd.f32 %v94_v52, %v80_v46  ;;  %v143_v49 = vlaneseq  ;;  %v137_v52 = vld [vmem:[%s448_s1] sm:$0x1]  ;;  %s310_s1 = smov [#allocation5]  }
  0x29   :  { %v58_v58 = vadd.f32 %v57_v53, %v406_v50  ;;  %v96_v59 = vadd.f32 %v95_v57, %v81_v51  ;;  %v144_v51 = vshrl.u32 %v143_v49, 7 }
  0x2b   :  { %v61_v60 = vadd.f32 %v60_v55, %v58_v58  ;;  %v97_v62 = vadd.f32 %v96_v59, %v82_v56  ;;  %v145_v53 = vsub.s32 0, %v144_v51  ;;  %v139_v56 = vld [vmem:[%s449_s2] sm:$0x1]  ;;  %s239_s2 = sshll.u32 %s310_s1, 4  ;;  %s240_s2 = int_to_ptr.vmem [resolvable:$true] %s239_s2 }
  0x2c   :  { %s280_s25 = scalar_lea.vmem %s240_s2, 2048  ;;  %p285_p6 = scmp.lt.s32.totalorder %s240_s2, %s240_s2 }
  0x2d   :  { %v62_v63 = vrot.slane %v61_v60, 4  ;;  %v99_v3 = vadd.f32 %v98_v61, %v97_v62  ;;  %p281_p5 = scmp.ne.s32.totalorder %s240_s2, %s280_s25  ;;  %p286_p7 = scmp.lt.s32.totalorder %s280_s25, %s280_s25 }
  0x2f   :  { %v63_v4 = vadd.f32 %v62_v63, %v61_v60  ;;  %v100_v5 = vrot.slane %v99_v3, 4  ;;  %p287_p8 = por %p286_p7, %p285_p6 }
  0x31   :  { %v64_v7 = vrot.slane %v63_v4, 2  ;;  %v101_v8 = vadd.f32 %v100_v5, %v99_v3  ;;  %p288_p9 = pnand %p287_p8, %p281_p5 }
  0x33   :  { %v65_v10 = vadd.f32 %v64_v7, %v63_v4  ;;  %v102_v11 = vrot.slane %v101_v8, 2 }
  0x35   :  { %v66_v12 = vrot.slane %v65_v10, 1  ;;  %v103_v14 = vadd.f32 %v102_v11, %v101_v8 }
  0x37   :  { %v67_v15 = vadd.f32 %v66_v12, %v65_v10  ;;  %v104_v16 = vrot.slane %v103_v14, 1 }
  0x39   :  { %106 = vrot.lane.b32.xlu0 %v67_v15, %s306_s16  ;;  %v105_v18 = vadd.f32 %v104_v16, %v103_v14 }
  0x3d   :  { %118 = vrot.lane.b32.xlu0 %v105_v18, %s306_s16 }
  0xab   :  { %v107_v19 = vpop.permute.xlu0 %106 }
  0xac   :  { %v108_v20 = vadd.f32 %v107_v19, %v67_v15 }
  0xae   :  { %109 = vrot.lane.b32.xlu1 %v108_v20, %s307_s0 }
  0xaf   :  { %v119_v22 = vpop.permute.xlu0 %118 }
  0xb0   :  { %v120_v23 = vadd.f32 %v119_v22, %v105_v18 }
  0xb2   :  { %121 = vrot.lane.b32.xlu1 %v120_v23, %s307_s0 }
 0x120   :  { %v110_v24 = vpop.permute.xlu1 %109 }
 0x121   :  { %v111_v26 = vadd.f32 %v110_v24, %v108_v20 }
 0x123   :  { %112 = vrot.lane.b32.xlu0 %v111_v26, %s308_s19 }
 0x124   :  { %v122_v27 = vpop.permute.xlu1 %121 }
 0x125   :  { %v123_v28 = vadd.f32 %v122_v27, %v120_v23 }
 0x127   :  { %124 = vrot.lane.b32.xlu1 %v123_v28, %s308_s19 }
 0x195   :  { %v113_v30 = vpop.permute.xlu0 %112 }
 0x196   :  { %v114_v31 = vadd.f32 %v113_v30, %v111_v26 }
 0x198   :  { %115 = vrot.lane.b32.xlu0 %v114_v31, %s309_s20 }
 0x199   :  { %v125_v32 = vpop.permute.xlu1 %124 }
 0x19a   :  { %v126_v34 = vadd.f32 %v125_v32, %v123_v28 }
 0x19c   :  { %127 = vrot.lane.b32.xlu1 %v126_v34, %s309_s20 }
 0x20a   :  { %v116_v35 = vpop.permute.xlu0 %115 }
 0x20b   :  { %v117_v36 = vadd.f32 %v116_v35, %v114_v31 }
 0x20d   :  { %v130_v38 = vmul.f32 0.0005, %v117_v36 }
 0x20e   :  { %v128_v39 = vpop.permute.xlu1 %127 }
 0x20f   :  { %v129_v40 = vadd.f32 %v128_v39, %v126_v34  ;;  %v132_v42 = vmul.f32 %v130_v38, %v130_v38 }
 0x211   :  { %v131_v43 = vmul.f32 0.0005, %v129_v40 }
 0x213   :  { %v133_v44 = vsub.f32 %v131_v43, %v132_v42 }
 0x215   :  { %v134_v46 = vmax.f32 %v133_v44, 0.0 }
 0x217   :  { %v135_v47 = vadd.f32 0.0001, %v134_v46 }
 0x219   :  { %258 = vrsqrt.f32 %v135_v47 }
 0x226   :  { %v259_v54 = vpop.eup %258 }
 0x227   :  { %v138_v55 = vmul.f32 %v259_v54, %v137_v52 }
 0x229   :  { %v140_v57 = vmul.f32 %v138_v55, %v130_v38  ;;  %v146_v58 = vrot.slane %v138_v55, %v145_v53 }
 0x22b   :  { %v141_v59 = vsub.f32 %v139_v56, %v140_v57  ;;  %v148_v60 = vmul.f32 %v146_v58, %v337_v0  ;;  %v149_v61 = vmul.f32 %v146_v58, %v339_v1  ;;  %v150_v62 = vmul.f32 %v146_v58, %v341_v2 }
 0x22c   :  { %v151_v63 = vmul.f32 %v146_v58, %v349_v6  ;;  %v152_v3 = vmul.f32 %v146_v58, %v354_v9  ;;  %v153_v4 = vmul.f32 %v146_v58, %v359_v13  ;;  %v154_v7 = vmul.f32 %v146_v58, %v364_v17 }
 0x22d   :  { %v168_v5 = vrot.slane %v141_v59, %v145_v53  ;;  %v155_v8 = vmul.f32 %v146_v58, %v369_v21  ;;  %v156_v10 = vmul.f32 %v146_v58, %v374_v25  ;;  %v157_v11 = vmul.f32 %v146_v58, %v379_v29 }
 0x22e   :  { %v158_v0 = vmul.f32 %v146_v58, %v384_v33  ;;  %v159_v1 = vmul.f32 %v146_v58, %v389_v37  ;;  %v160_v2 = vmul.f32 %v146_v58, %v394_v41  ;;  %v161_v6 = vmul.f32 %v146_v58, %v399_v45 }
 0x22f   :  { %v162_v9 = vmul.f32 %v146_v58, %v406_v50  ;;  %v170_v13 = vadd.f32 %v168_v5, %v148_v60  ;;  %v171_v12 = vadd.f32 %v168_v5, %v149_v61  ;;  %v163_v17 = vmul.f32 %v146_v58, %v403_v48 }
 0x230   :  { %v172_v14 = vadd.f32 %v168_v5, %v150_v62  ;;  %v173_v21 = vadd.f32 %v168_v5, %v151_v63  ;;  %v174_v15 = vadd.f32 %v168_v5, %v152_v3  ;;  %v175_v25 = vadd.f32 %v168_v5, %v153_v4 }
 0x231   :  { %v176_v16 = vadd.f32 %v168_v5, %v154_v7  ;;  %v177_v29 = vadd.f32 %v168_v5, %v155_v8  ;;  %v178_v18 = vadd.f32 %v168_v5, %v156_v10  ;;  %v179_v33 = vadd.f32 %v168_v5, %v157_v11 }
 0x232   :  { %v180_v19 = vadd.f32 %v168_v5, %v158_v0  ;;  %v181_v37 = vadd.f32 %v168_v5, %v159_v1  ;;  %v182_v20 = vadd.f32 %v168_v5, %v160_v2  ;;  %v183_v41 = vadd.f32 %v168_v5, %v161_v6 }
 0x233   :  { %v184_v22 = vadd.f32 %v168_v5, %v162_v9  ;;  %v186_v45 = vmul.f32 0.333, %v170_v13  ;;  %v187_v23 = vmul.f32 0.333, %v171_v12  ;;  %v185_v50 = vadd.f32 %v168_v5, %v163_v17 }
 0x234   :  { %v188_v24 = vmul.f32 0.333, %v172_v14  ;;  %v189_v26 = vmul.f32 0.333, %v173_v21  ;;  %v190_v27 = vmul.f32 0.333, %v174_v15 }
 0x235   :  { %v191_v48 = vmul.f32 0.333, %v175_v25  ;;  %v192_v28 = vmul.f32 0.333, %v176_v16  ;;  %v193_v30 = vmul.f32 0.333, %v177_v29  ;;  %v202_v31 = vmax.f32 %v170_v13, %v186_v45 }
 0x236   :  { %v194_v32 = vmul.f32 0.333, %v178_v18  ;;  %v195_v34 = vmul.f32 0.333, %v179_v33  ;;  %v196_v35 = vmul.f32 0.333, %v180_v19  ;;  %v203_v36 = vmax.f32 %v171_v12, %v187_v23 }
 0x237   :  { %v197_v38 = vmul.f32 0.333, %v181_v37  ;;  %v198_v39 = vmul.f32 0.333, %v182_v20  ;;  %v199_v40 = vmul.f32 0.333, %v183_v41  ;;  %v204_v42 = vmax.f32 %v172_v14, %v188_v24 }
 0x238   :  { %218 = vst [vmem:[#allocation5] sm:$0xff] %v202_v31  ;;  %v200_v43 = vmul.f32 0.333, %v184_v22  ;;  %v201_v44 = vmul.f32 0.333, %v185_v50  ;;  %v205_v46 = vmax.f32 %v173_v21, %v189_v26  ;;  %v206_v47 = vmax.f32 %v174_v15, %v190_v27  ;;  %219 = vst [vmem:[#allocation5 + $0x8] sm:$0xff] %v203_v36 }
 0x239   :  { %v207_v49 = vmax.f32 %v175_v25, %v191_v48  ;;  %v208_v51 = vmax.f32 %v176_v16, %v192_v28  ;;  %v209_v52 = vmax.f32 %v177_v29, %v193_v30  ;;  %v210_v53 = vmax.f32 %v178_v18, %v194_v32  ;;  %220 = vst [vmem:[#allocation5 + $0x10] sm:$0xff] %v204_v42 }
 0x23a   :  { %v211_v54 = vmax.f32 %v179_v33, %v195_v34  ;;  %v212_v55 = vmax.f32 %v180_v19, %v196_v35  ;;  %v213_v56 = vmax.f32 %v181_v37, %v197_v38  ;;  %v214_v57 = vmax.f32 %v182_v20, %v198_v39  ;;  %221 = vst [vmem:[#allocation5 + $0x18] sm:$0xff] %v205_v46 }
 0x23b   :  { %222 = vst [vmem:[#allocation5 + $0x20] sm:$0xff] %v206_v47  ;;  %v215_v58 = vmax.f32 %v183_v41, %v199_v40  ;;  %v216_v59 = vmax.f32 %v184_v22, %v200_v43  ;;  %v217_v60 = vmax.f32 %v185_v50, %v201_v44  ;;  %223 = vst [vmem:[#allocation5 + $0x28] sm:$0xff] %v207_v49 }
 0x23c   :  { %224 = vst [vmem:[#allocation5 + $0x30] sm:$0xff] %v208_v51  ;;  %225 = vst [vmem:[#allocation5 + $0x38] sm:$0xff] %v209_v52 }
 0x23d   :  { %226 = vst [vmem:[#allocation5 + $0x40] sm:$0xff] %v210_v53  ;;  %227 = vst [vmem:[#allocation5 + $0x48] sm:$0xff] %v211_v54 }
 0x23e   :  { %228 = vst [vmem:[#allocation5 + $0x50] sm:$0xff] %v212_v55  ;;  %229 = vst [vmem:[#allocation5 + $0x58] sm:$0xff] %v213_v56 }
 0x23f   :  { %230 = vst [vmem:[#allocation5 + $0x60] sm:$0xff] %v214_v57  ;;  %231 = vst [vmem:[#allocation5 + $0x68] sm:$0xff] %v215_v58 }
 0x240   :  { %232 = vst [vmem:[#allocation5 + $0x70] sm:$0xff] %v216_v59  ;;  %233 = vst [vmem:[#allocation5 + $0x78] sm:$0x1f] %v217_v60 }
 0x241   :  { %291 = shalt.err (!%p288_p9)
}
 0x242   :  { %245 = dma.vmem_to_hbm [thread:$0]  %s240_s2, 2048, %s450_s3, [#allocation4], %s305_s15, %s305_s15, %s306_s16  }
 0x243   :  { %302 = dma.done.wait [#allocation4], 2048  }
 0x244   :  { %303 = vsyncadd [#allocation4], 4294965248 }
 0x245   :  { %249 = vsyncpa [#allocation3], 1 }
 0x246   :  { %250 = vsyncpa [#allocation4], 1 }

</bundles_post_ra>
